<compile_context>
chip_gen: v7x
topology: tpu7x:2x2x1
jax: 0.10.0
libtpu: 0.0.40
codegen_flags: <defaults>
</compile_context>

<pallas_src>
import jax
import jax.numpy as jnp
from jax.experimental import pallas as pl
from jax.experimental.pallas import tpu as pltpu

N_LAYERS = 1   # in_features of nn.Linear(N_layers, 2, bias=False)
N_OUT = 2

LANES = 128      # batch maps onto the lane axis
ROW_TILE = 512   # rows per grid step when B is large: 512*128*4B = 256 KiB per block


def _policy_kernel(w_ref, x_ref, o_ref):
    # w_ref: (2,) f32 in SMEM  (PyTorch weight flattened: [w0, w1])
    # x_ref: (row_tile, 128) f32 in VMEM  -- batch laid out lane-dense
    # o_ref: (2, row_tile, 128) f32 in VMEM -- plane 0 = p(class 0), plane 1 = p(class 1)
    z = (w_ref[0] - w_ref[1]) * x_ref[...]          # logit0 - logit1 (VPU broadcast mul)
    p0 = 0.5 * (jnp.tanh(0.5 * z) + 1.0)            # sigmoid(z) via single EUP tanh
    o_ref[0, :, :] = p0
    o_ref[1, :, :] = 1.0 - p0


def policy_network_forward(state, weight):
    """state: (B, N_LAYERS=1) f32, weight: (N_OUT=2, N_LAYERS=1) f32 (PyTorch layout).
    Returns softmax(state @ weight.T, axis=-1) with shape (B, N_OUT)."""
    B = state.shape[0]
    x = jnp.asarray(state, jnp.float32).reshape(B)          # (B,)
    w = jnp.asarray(weight, jnp.float32).reshape(N_OUT)      # (2,) -> SMEM

    # Lane-dense padding: batch -> (rows, 128).
    rows_needed = max(1, pl.cdiv(B, LANES))
    if rows_needed <= ROW_TILE:
        row_tile = rows_needed          # single grid step; full-array block (exempt from 8x128 rule)
        rows = rows_needed
    else:
        row_tile = ROW_TILE             # tiled path for big batches (multiple of 8 sublanes)
        rows = pl.cdiv(rows_needed, ROW_TILE) * ROW_TILE
    b_pad = rows * LANES
    n_tiles = rows // row_tile

    x_pad = jnp.zeros((b_pad,), jnp.float32).at[:B].set(x).reshape(rows, LANES)

    out = pl.pallas_call(
        _policy_kernel,
        out_shape=jax.ShapeDtypeStruct((2, rows, LANES), jnp.float32),
        grid=(n_tiles,),
        in_specs=[
            pl.BlockSpec(memory_space=pltpu.MemorySpace.SMEM),       # 2 weight scalars
            pl.BlockSpec((row_tile, LANES), lambda i: (i, 0)),       # lane-dense batch tile
        ],
        out_specs=pl.BlockSpec((2, row_tile, LANES), lambda i: (0, i, 0)),
        compiler_params=pltpu.CompilerParams(
            dimension_semantics=("parallel",),   # shard batch tiles across TCs (v7x megacore)
        ),
    )(w, x_pad)

    # Glue: (2, rows, 128) -> (2, B) -> (B, 2); tiny transpose done in plain JAX.
    probs = out.reshape(2, b_pad)[:, :B].T
    return probs


def _ref_forward(state, weight):
    logits = state @ weight.T
    return jax.nn.softmax(logits, axis=-1)


if __name__ == "__main__":
    key = jax.random.PRNGKey(0)
    k_w, k_x = jax.random.split(key)

    batch = 8
    # Deterministic parameter init mimicking nn.Linear's uniform(-1/sqrt(in), 1/sqrt(in))
    bound = 1.0 / (N_LAYERS ** 0.5)
    weight = jax.random.uniform(
        k_w, (N_OUT, N_LAYERS), dtype=jnp.float32, minval=-bound, maxval=bound
    )
    state = jax.random.normal(k_x, (batch, N_LAYERS), dtype=jnp.float32)

    out = policy_network_forward(state, weight)
    out = jax.block_until_ready(out)

    ref = _ref_forward(state, weight)
    assert out.shape == (batch, N_OUT)
    assert jnp.allclose(out, ref, atol=1e-5, rtol=1e-5), "mismatch vs reference"
    assert jnp.allclose(jnp.sum(out, axis=-1), 1.0, atol=1e-6), "softmax rows must sum to 1"

    print("KERNEL_OK")
</pallas_src>

<mosaic_0001>
module attributes {stable_mosaic.version = 11 : i64} {
  func.func @_policy_kernel(%arg0: i32, %arg1: memref<2xf32, #tpu.memory_space<smem>>, %arg2: memref<1x128xf32, #tpu.memory_space<vmem>>, %arg3: memref<2x1x128xf32, #tpu.memory_space<vmem>>) attributes {dimension_semantics = [#tpu.dimension_semantics<parallel>], iteration_bounds = array<i64: 1>, scalar_prefetch = 0 : i64, scratch_operands = 0 : i64, tpu.core_type = #tpu.core_type<tc>, window_params = [{transform_indices = @transform_0, window_bounds = array<i64: 2>}, {transform_indices = @transform_1, window_bounds = array<i64: 1, 128>}, {transform_indices = @transform_2, window_bounds = array<i64: 2, 1, 128>}]} {
    %c0 = arith.constant 0 : index
    %0 = memref.load %arg1[%c0] : memref<2xf32, #tpu.memory_space<smem>>
    %c1 = arith.constant 1 : index
    %1 = memref.load %arg1[%c1] : memref<2xf32, #tpu.memory_space<smem>>
    %2 = arith.subf %0, %1 : f32
    %c0_0 = arith.constant 0 : index
    %c0_1 = arith.constant 0 : index
    %3 = vector.load %arg2[%c0_0, %c0_1] : memref<1x128xf32, #tpu.memory_space<vmem>>, vector<1x128xf32>
    %4 = vector.broadcast %2 : f32 to vector<1x128xf32>
    %5 = arith.mulf %4, %3 : vector<1x128xf32>
    %cst = arith.constant 5.000000e-01 : f32
    %6 = vector.broadcast %cst : f32 to vector<1x128xf32>
    %7 = arith.mulf %6, %5 : vector<1x128xf32>
    %8 = math.tanh %7 : vector<1x128xf32>
    %cst_2 = arith.constant 1.000000e+00 : f32
    %9 = vector.broadcast %cst_2 : f32 to vector<1x128xf32>
    %10 = arith.addf %8, %9 : vector<1x128xf32>
    %cst_3 = arith.constant 5.000000e-01 : f32
    %11 = vector.broadcast %cst_3 : f32 to vector<1x128xf32>
    %12 = arith.mulf %11, %10 : vector<1x128xf32>
    %c0_4 = arith.constant 0 : index
    %c0_5 = arith.constant 0 : index
    %c0_6 = arith.constant 0 : index
    %13 = vector.load %arg3[%c0_4, %c0_5, %c0_6] : memref<2x1x128xf32, #tpu.memory_space<vmem>>, vector<1x1x128xf32>
    %14 = vector.shape_cast %13 : vector<1x1x128xf32> to vector<1x128xf32>
    %15 = vector.shape_cast %12 : vector<1x128xf32> to vector<1x1x128xf32>
    tpu.vector_store %arg3[%c0_4, %c0_5, %c0_6], %15 {strides = array<i32>} : memref<2x1x128xf32, #tpu.memory_space<vmem>>, vector<1x1x128xf32>,
    %cst_7 = arith.constant 1.000000e+00 : f32
    %16 = vector.broadcast %cst_7 : f32 to vector<1x128xf32>
    %17 = arith.subf %16, %12 : vector<1x128xf32>
    %c1_8 = arith.constant 1 : index
    %c0_9 = arith.constant 0 : index
    %c0_10 = arith.constant 0 : index
    %18 = vector.load %arg3[%c1_8, %c0_9, %c0_10] : memref<2x1x128xf32, #tpu.memory_space<vmem>>, vector<1x1x128xf32>
    %19 = vector.shape_cast %18 : vector<1x1x128xf32> to vector<1x128xf32>
    %20 = vector.shape_cast %17 : vector<1x128xf32> to vector<1x1x128xf32>
    tpu.vector_store %arg3[%c1_8, %c0_9, %c0_10], %20 {strides = array<i32>} : memref<2x1x128xf32, #tpu.memory_space<vmem>>, vector<1x1x128xf32>,
    return
  }
  func.func @transform_0(%arg0: i32) -> i32 {
    %c0_i32 = arith.constant 0 : i32
    %c0_i32_0 = arith.constant 0 : i32
    return %c0_i32 : i32
  }
  func.func @transform_1(%arg0: i32) -> (i32, i32) {
    %c0_i32 = arith.constant 0 : i32
    %c0_i32_0 = arith.constant 0 : i32
    return %arg0, %c0_i32 : i32, i32
  }
  func.func @transform_2(%arg0: i32) -> (i32, i32, i32) {
    %c0_i32 = arith.constant 0 : i32
    %c0_i32_0 = arith.constant 0 : i32
    %c0_i32_1 = arith.constant 0 : i32
    return %c0_i32, %arg0, %c0_i32_0 : i32, i32, i32
  }
}

</mosaic_0001>

<bundles_post_ra>
// kernel: tpu_custom_call.1
= control target key start
LH: loop header
LB: loop body
LE: loop exit
PB: predicated region body
PF: predicated region fallthrough
CT: control target
= control target key end

     0   :  { %7 = vsyncpa [#allocation4], 0  ;;  %s143_s0 = inlined_call_operand.hbm [shape: f32[2], index: 0, kind: input, shape index: {}]   ;;  %s144_s1 = inlined_call_operand.vmem [shape: f32[1,128], index: 1, kind: input, shape index: {}]   ;;  %s145_s2 = inlined_call_operand.hbm [shape: f32[2,1,128], index: 2, kind: output, shape index: {}]  }
   0x1   :  { %8 = vsyncpa [#allocation3], 0  ;;  %s61_s11 = scalar_lea.hbm %s143_s0, 16 }
   0x2   :  { %p62_p0 = scmp.ne.s32.totalorder %s143_s0, %s61_s11  ;;  %p65_p1 = scmp.lt.u32.totalorder %s61_s11, %s143_s0 }
   0x4   :  { %p67_p2 = pnand %p65_p1, %p62_p0 }
   0x6   :  { %70 = shalt.err (!%p67_p2)
}
   0x7   :  { %s97_s16 = smov [#allocation2]  }
   0x8   :  { %16 = dma.hbm_to_smem %s143_s0, 16, %s97_s16, [#allocation4]  }
   0x9   :  { %93 = dma.done.wait [#allocation4], 16  }
   0xa   :  { %94 = vsyncadd [#allocation4], 4294967280 }
   0xb   :  { %22 = sfence }
   0xc   :  { %s23_s19 = sld [smem:[#allocation2]]  ;;  %s54_s20 = sld [smem:[#allocation2 + $0x1]]  ;;  %v26_v0 = vld [vmem:[%s144_s1] sm:$0x1] }
   0xd   :  { %s98_s24 = smov [#allocation5]  }
   0xe   :  { %s42_s25 = sshll.u32 %s98_s24, 4  ;;  %s43_s25 = int_to_ptr.vmem [resolvable:$true] %s42_s25 }
   0xf   :  { %s71_s0 = scalar_lea.vmem %s43_s25, 32  ;;  %p76_p4 = scmp.lt.s32.totalorder %s43_s25, %s43_s25 }
  0x10   :  { %p72_p3 = scmp.ne.s32.totalorder %s43_s25, %s71_s0  ;;  %p77_p5 = scmp.lt.s32.totalorder %s71_s0, %s71_s0 }
  0x12   :  { %s25_s21 = ssub.f32 %s23_s19, %s54_s20  ;;  %p78_p6 = por %p77_p5, %p76_p4 }
  0x14   :  { %v27_v1 = vstv %s25_s21  ;;  %p79_p7 = pnand %p78_p6, %p72_p3 }
  0x15   :  { %v28_v2 = vmul.f32 %v27_v1, %v26_v0 }
  0x17   :  { %v29_v3 = vmul.f32 0.5, %v28_v2 }
  0x19   :  { %59 = vtanh.f32 %v29_v3 }
  0x23   :  { %v60_v4 = vpop.eup %59 }
  0x24   :  { %v31_v5 = vadd.f32 1.0, %v60_v4 }
  0x26   :  { %v32_v6 = vmul.f32 0.5, %v31_v5 }
  0x28   :  { %33 = vst [vmem:[#allocation5] sm:$0x1] %v32_v6  ;;  %v34_v7 = vsub.f32 1.0, %v32_v6 }
  0x2a   :  { %36 = vst [vmem:[#allocation5 + $0x1] sm:$0x1] %v34_v7 }
  0x2b   :  { %82 = shalt.err (!%p79_p7)
}
  0x2c   :  { %s83_s27 = scalar_lea.hbm %s145_s2, 32 }
  0x2d   :  { %p84_p8 = scmp.ne.s32.totalorder %s145_s2, %s83_s27  ;;  %p87_p9 = scmp.lt.u32.totalorder %s83_s27, %s145_s2 }
  0x2f   :  { %p89_p10 = pnand %p87_p9, %p84_p8 }
  0x31   :  { %92 = shalt.err (!%p89_p10)
}
  0x32   :  { %s99_s4 = smov 16   ;;  %s100_s5 = smov 1  }
  0x33   :  { %48 = dma.vmem_to_hbm [thread:$0]  %s43_s25, 32, %s145_s2, [#allocation3], %s99_s4, %s99_s4, %s100_s5  }
  0x34   :  { %95 = dma.done.wait [#allocation3], 32  }
  0x35   :  { %96 = vsyncadd [#allocation3], 4294967264 }
  0x36   :  { %52 = vsyncpa [#allocation3], 1 }
  0x37   :  { %53 = vsyncpa [#allocation4], 1 }

</bundles_post_ra>
